<compile_context>
chip_gen: v5e
topology: v5e:2x2
jax: 0.10.0
libtpu: 0.0.40
codegen_flags: <defaults>
</compile_context>

<pallas_src>
import functools

import jax
import jax.numpy as jnp
from jax import lax
from jax.experimental import pallas as pl
from jax.experimental.pallas import tpu as pltpu


def _supcon_kernel(img_ref, txt_ref, lab_ref, out_ref,
                   m_sc, esum_sc, nsum_sc, nlogit_sc,
                   *, inv_temp, loss_scale):
    k = pl.program_id(1)

    @pl.when(k == 0)
    def _init():
        m_sc[...] = jnp.full_like(m_sc, -jnp.inf)
        esum_sc[...] = jnp.zeros_like(esum_sc)
        nsum_sc[...] = jnp.zeros_like(nsum_sc)
        nlogit_sc[...] = jnp.zeros_like(nlogit_sc)

    # Native-dtype operands straight into the MXU, f32 accumulation.  txt_ref
    # holds a (d, tm) tile of the pre-transposed text matrix, so the
    # contraction is the sublane dim of the RHS (no in-kernel transpose).
    # 1/temperature is applied once to the f32 logits tile (1 VPU op/elem).
    logits = lax.dot_general(
        img_ref[...], txt_ref[...],
        dimension_numbers=(((1,), (0,)), ((), ())),
        preferred_element_type=jnp.float32) * inv_temp          # (TN, TM) f32

    labels = lab_ref[...].astype(jnp.float32)
    neg = 1.0 - labels

    # Online (flash-style) masked log-sum-exp over the M (reduction) axis.
    m_prev = m_sc[...]
    m_new = jnp.maximum(m_prev, jnp.max(logits, axis=1, keepdims=True))
    corr = jnp.exp(m_prev - m_new)                   # 0 at the first step
    esum_sc[...] = corr * esum_sc[...] + jnp.sum(
        jnp.exp(logits - m_new) * labels, axis=1, keepdims=True)
    nsum_sc[...] = nsum_sc[...] + jnp.sum(neg, axis=1, keepdims=True)
    nlogit_sc[...] = nlogit_sc[...] + jnp.sum(neg * logits, axis=1,
                                              keepdims=True)
    m_sc[...] = m_new

    @pl.when(k == pl.num_programs(1) - 1)
    def _finalize():
        # log_prob_j = logits_j - (m + log(sum_k exp(logits_k - m)*labels_k))
        # mean over the (1 - labels) entries of each row.  Matches the
        # reference exactly (including inf/NaN for degenerate all-ones /
        # all-zeros label rows; production data must avoid those).
        lse = m_sc[...] + jnp.log(esum_sc[...])
        mean_log_prob_pos = nlogit_sc[...] / nsum_sc[...] - lse
        out_ref[...] = loss_scale * mean_log_prob_pos


def _pick_tile(dim, cap, align):
    """Largest divisor of `dim` that is a multiple of `align` and <= cap.

    Falls back to the full dimension (a single block) when no such divisor
    exists (e.g. prime sizes).
    """
    if dim <= cap:
        return dim
    t = cap - (cap % align)
    while t >= align:
        if dim % t == 0:
            return t
        t -= align
    return dim


def _vmem_budget_bytes():
    cap = 64 * 1024 * 1024            # conservative default: v7x per-TC VMEM
    try:
        info = pltpu.get_tpu_info()
        cap = int(getattr(info, "vmem_capacity_bytes", cap))
    except Exception:
        pass
    return int(cap * 0.7)             # headroom for compiler-internal scratch


def _pick_tiles(n, m, d, img_sz, txt_sz, lab_sz, budget):
    def need(tn, tm):
        return (2 * tn * d * img_sz      # image tile (double-buffered)
                + 2 * d * tm * txt_sz    # text tile  (double-buffered)
                + 2 * tn * tm * lab_sz   # label tile (double-buffered)
                + 2 * tn * tm * 4        # f32 logits / exp temporaries
                + 32 * tn)               # (tn, 1) accumulators + output

    tn_cap = 512
    if n >= 16:
        # Keep >= 2 row blocks so the "parallel" axis can shard across the
        # 2 TensorCores of a v7x chip (harmless elsewhere).
        tn_cap = min(tn_cap, max(8, (n // 2) // 8 * 8))
    tn = _pick_tile(n, tn_cap, 8)

    # Largest column (reduction) tile that fits the VMEM budget.
    tm = _pick_tile(m, 128, 128)
    for cap in (4096, 2048, 1024, 512, 256, 128):
        cand = _pick_tile(m, cap, 128)
        if need(tn, cand) <= budget:
            tm = cand
            break

    # If even the smallest column tile is over budget, shrink the row tile.
    while need(tn, tm) > budget and tn > 8:
        new_tn = _pick_tile(n, max(8, (tn // 2) // 8 * 8), 8)
        if new_tn == tn:
            break
        tn = new_tn
    return tn, tm


def supcon_loss(image_features, text_features, text_labels,
                temperature=0.05, base_temperature=0.05):
    n, d = image_features.shape
    m, d2 = text_features.shape
    assert d == d2 and text_labels.shape == (n, m)

    # One-time (d, m) transpose in the wrapper, amortized over every row
    # block that re-streams the text matrix; keeps the contraction off the
    # XLU inside the kernel.
    text_t = text_features.T

    budget = _vmem_budget_bytes()
    tn, tm = _pick_tiles(
        n, m, d,
        img_sz=image_features.dtype.itemsize,
        txt_sz=text_t.dtype.itemsize,
        lab_sz=text_labels.dtype.itemsize,
        budget=budget)
    grid = (n // tn, m // tm)

    kernel = functools.partial(
        _supcon_kernel,
        inv_temp=1.0 / float(temperature),
        loss_scale=-(float(temperature) / float(base_temperature)))

    per_row = pl.pallas_call(
        kernel,
        out_shape=jax.ShapeDtypeStruct((n, 1), jnp.float32),
        grid_spec=pltpu.PrefetchScalarGridSpec(
            num_scalar_prefetch=0,
            grid=grid,
            in_specs=[
                pl.BlockSpec((tn, d), lambda i, k: (i, 0)),   # image rows
                pl.BlockSpec((d, tm), lambda i, k: (0, k)),   # text^T cols
                pl.BlockSpec((tn, tm), lambda i, k: (i, k)),  # label tile
            ],
            out_specs=pl.BlockSpec((tn, 1), lambda i, k: (i, 0)),
            scratch_shapes=[pltpu.VMEM((tn, 1), jnp.float32)] * 4,
        ),
        compiler_params=pltpu.CompilerParams(
            dimension_semantics=("parallel", "arbitrary"),
            vmem_limit_bytes=budget),
    )(image_features, text_t, text_labels)

    # Final scalar mean over rows: trivial reduction, done outside the kernel
    # so the row axis can stay "parallel" across TensorCores.
    return jnp.mean(per_row)


def _supcon_loss_ref(image_features, text_features, text_labels,
                     temperature=0.05, base_temperature=0.05):
    logits = image_features.astype(jnp.float32) @ \
        text_features.astype(jnp.float32).T / temperature
    logits = logits - jnp.max(logits, axis=1, keepdims=True)
    labels = text_labels.astype(jnp.float32)
    exp_logits = jnp.exp(logits) * labels
    log_prob = logits - jnp.log(jnp.sum(exp_logits, axis=1, keepdims=True))
    neg = 1.0 - labels
    mean_log_prob_pos = jnp.sum(neg * log_prob, axis=1) / jnp.sum(neg, axis=1)
    loss = -(temperature / base_temperature) * mean_log_prob_pos
    return jnp.mean(loss)


if __name__ == "__main__":
    N, M, D = 8, 8, 32  # batch of images, batch of texts, feature dim

    key = jax.random.PRNGKey(0)
    k_img, k_txt = jax.random.split(key)
    image_features = jax.random.normal(k_img, (N, D), dtype=jnp.float32)
    text_features = jax.random.normal(k_txt, (M, D), dtype=jnp.float32)

    # L2-normalize (standard for contrastive features).  With temperature=0.05
    # this keeps logits in ~[-20, 20] so the masked exp-sum never underflows.
    image_features = image_features / jnp.linalg.norm(
        image_features, axis=-1, keepdims=True)
    text_features = text_features / jnp.linalg.norm(
        text_features, axis=-1, keepdims=True)

    # Deterministic 0/1 label mask with both zeros and ones in every row
    # (avoids log(0) and divide-by-zero in the loss definition).  The kernel
    # also accepts int8/bool labels to cut the (N, M) HBM stream 4x.
    rows = jnp.arange(N)[:, None]
    cols = jnp.arange(M)[None, :]
    text_labels = ((rows + cols) % 2).astype(jnp.float32)

    loss = supcon_loss(image_features, text_features, text_labels)
    loss = jax.block_until_ready(loss)

    ref = _supcon_loss_ref(image_features, text_features, text_labels)
    assert jnp.isfinite(loss), loss
    assert jnp.allclose(loss, ref, rtol=1e-5, atol=1e-5), (loss, ref)

    print("KERNEL_OK")
</pallas_src>

<mosaic_0001>
module attributes {stable_mosaic.version = 11 : i64} {
  func.func @_supcon_kernel(%arg0: i32, %arg1: i32, %arg2: memref<8x32xf32, #tpu.memory_space<vmem>>, %arg3: memref<32x8xf32, #tpu.memory_space<vmem>>, %arg4: memref<8x8xf32, #tpu.memory_space<vmem>>, %arg5: memref<8x1xf32, #tpu.memory_space<vmem>>, %arg6: memref<8x1xf32, #tpu.memory_space<vmem>>, %arg7: memref<8x1xf32, #tpu.memory_space<vmem>>, %arg8: memref<8x1xf32, #tpu.memory_space<vmem>>, %arg9: memref<8x1xf32, #tpu.memory_space<vmem>>) attributes {dimension_semantics = [#tpu.dimension_semantics<parallel>, #tpu.dimension_semantics<arbitrary>], iteration_bounds = array<i64: 1, 1>, scalar_prefetch = 0 : i64, scratch_operands = 4 : i64, tpu.core_type = #tpu.core_type<tc>, window_params = [{transform_indices = @transform_0, window_bounds = array<i64: 8, 32>}, {transform_indices = @transform_1, window_bounds = array<i64: 32, 8>}, {transform_indices = @transform_2, window_bounds = array<i64: 8, 8>}, {transform_indices = @transform_3, window_bounds = array<i64: 8, 1>}]} {
    %c0_i32 = arith.constant 0 : i32
    %0 = arith.cmpi eq, %arg1, %c0_i32 : i32
    %1 = arith.extui %0 : i1 to i32
    %c0_i32_0 = arith.constant 0 : i32
    %2 = arith.cmpi ne, %1, %c0_i32_0 : i32
    scf.if %2 {
      %cst_30 = arith.constant 0xFF800000 : f32
      %42 = vector.broadcast %cst_30 : f32 to vector<8x1xf32>
      %c0_31 = arith.constant 0 : index
      %c0_32 = arith.constant 0 : index
      %43 = vector.load %arg6[%c0_31, %c0_32] : memref<8x1xf32, #tpu.memory_space<vmem>>, vector<8x1xf32>
      tpu.vector_store %arg6[%c0_31, %c0_32], %42 {strides = array<i32>} : memref<8x1xf32, #tpu.memory_space<vmem>>, vector<8x1xf32>,
      %cst_33 = arith.constant 0.000000e+00 : f32
      %44 = vector.broadcast %cst_33 : f32 to vector<8x1xf32>
      %c0_34 = arith.constant 0 : index
      %c0_35 = arith.constant 0 : index
      %45 = vector.load %arg7[%c0_34, %c0_35] : memref<8x1xf32, #tpu.memory_space<vmem>>, vector<8x1xf32>
      tpu.vector_store %arg7[%c0_34, %c0_35], %44 {strides = array<i32>} : memref<8x1xf32, #tpu.memory_space<vmem>>, vector<8x1xf32>,
      %cst_36 = arith.constant 0.000000e+00 : f32
      %46 = vector.broadcast %cst_36 : f32 to vector<8x1xf32>
      %c0_37 = arith.constant 0 : index
      %c0_38 = arith.constant 0 : index
      %47 = vector.load %arg8[%c0_37, %c0_38] : memref<8x1xf32, #tpu.memory_space<vmem>>, vector<8x1xf32>
      tpu.vector_store %arg8[%c0_37, %c0_38], %46 {strides = array<i32>} : memref<8x1xf32, #tpu.memory_space<vmem>>, vector<8x1xf32>,
      %cst_39 = arith.constant 0.000000e+00 : f32
      %48 = vector.broadcast %cst_39 : f32 to vector<8x1xf32>
      %c0_40 = arith.constant 0 : index
      %c0_41 = arith.constant 0 : index
      %49 = vector.load %arg9[%c0_40, %c0_41] : memref<8x1xf32, #tpu.memory_space<vmem>>, vector<8x1xf32>
      tpu.vector_store %arg9[%c0_40, %c0_41], %48 {strides = array<i32>} : memref<8x1xf32, #tpu.memory_space<vmem>>, vector<8x1xf32>,
    } else {
    }
    %c0 = arith.constant 0 : index
    %c0_1 = arith.constant 0 : index
    %3 = vector.load %arg2[%c0, %c0_1] : memref<8x32xf32, #tpu.memory_space<vmem>>, vector<8x32xf32>
    %c0_2 = arith.constant 0 : index
    %c0_3 = arith.constant 0 : index
    %4 = vector.load %arg3[%c0_2, %c0_3] : memref<32x8xf32, #tpu.memory_space<vmem>>, vector<32x8xf32>
    %cst = arith.constant dense<0.000000e+00> : vector<8x8xf32>
    %5 = tpu.matmul %3, %4, %cst {dimension_numbers = #tpu.dot_dimension_numbers<[1], [0], [0], [1], [0, 0, 1, 1], [], []>} : vector<8x32xf32>, vector<32x8xf32>, vector<8x8xf32> -> vector<8x8xf32>
    %cst_4 = arith.constant 2.000000e+01 : f32
    %6 = vector.broadcast %cst_4 : f32 to vector<8x8xf32>
    %7 = arith.mulf %5, %6 : vector<8x8xf32>
    %c0_5 = arith.constant 0 : index
    %c0_6 = arith.constant 0 : index
    %8 = vector.load %arg4[%c0_5, %c0_6] : memref<8x8xf32, #tpu.memory_space<vmem>>, vector<8x8xf32>
    %cst_7 = arith.constant 1.000000e+00 : f32
    %9 = vector.broadcast %cst_7 : f32 to vector<8x8xf32>
    %10 = arith.subf %9, %8 : vector<8x8xf32>
    %c0_8 = arith.constant 0 : index
    %c0_9 = arith.constant 0 : index
    %11 = vector.load %arg6[%c0_8, %c0_9] : memref<8x1xf32, #tpu.memory_space<vmem>>, vector<8x1xf32>
    %cst_10 = arith.constant dense<0xFF800000> : vector<8xf32>
    %12 = vector.multi_reduction <maximumf>, %7, %cst_10 [1] : vector<8x8xf32> to vector<8xf32>
    %13 = vector.shape_cast %12 : vector<8xf32> to vector<8x1xf32>
    %14 = arith.maximumf %11, %13 : vector<8x1xf32>
    %15 = arith.subf %11, %14 : vector<8x1xf32>
    %16 = math.exp %15 : vector<8x1xf32>
    %c0_11 = arith.constant 0 : index
    %c0_12 = arith.constant 0 : index
    %17 = vector.load %arg7[%c0_11, %c0_12] : memref<8x1xf32, #tpu.memory_space<vmem>>, vector<8x1xf32>
    %18 = arith.mulf %16, %17 : vector<8x1xf32>
    %19 = vector.broadcast %14 : vector<8x1xf32> to vector<8x8xf32>
    %20 = arith.subf %7, %19 : vector<8x8xf32>
    %21 = math.exp %20 : vector<8x8xf32>
    %22 = arith.mulf %21, %8 : vector<8x8xf32>
    %cst_13 = arith.constant dense<0.000000e+00> : vector<8xf32>
    %23 = vector.multi_reduction <add>, %22, %cst_13 [1] : vector<8x8xf32> to vector<8xf32>
    %24 = vector.shape_cast %23 : vector<8xf32> to vector<8x1xf32>
    %25 = arith.addf %18, %24 : vector<8x1xf32>
    %c0_14 = arith.constant 0 : index
    %c0_15 = arith.constant 0 : index
    %26 = vector.load %arg7[%c0_14, %c0_15] : memref<8x1xf32, #tpu.memory_space<vmem>>, vector<8x1xf32>
    tpu.vector_store %arg7[%c0_14, %c0_15], %25 {strides = array<i32>} : memref<8x1xf32, #tpu.memory_space<vmem>>, vector<8x1xf32>,
    %c0_16 = arith.constant 0 : index
    %c0_17 = arith.constant 0 : index
    %27 = vector.load %arg8[%c0_16, %c0_17] : memref<8x1xf32, #tpu.memory_space<vmem>>, vector<8x1xf32>
    %cst_18 = arith.constant dense<0.000000e+00> : vector<8xf32>
    %28 = vector.multi_reduction <add>, %10, %cst_18 [1] : vector<8x8xf32> to vector<8xf32>
    %29 = vector.shape_cast %28 : vector<8xf32> to vector<8x1xf32>
    %30 = arith.addf %27, %29 : vector<8x1xf32>
    %c0_19 = arith.constant 0 : index
    %c0_20 = arith.constant 0 : index
    %31 = vector.load %arg8[%c0_19, %c0_20] : memref<8x1xf32, #tpu.memory_space<vmem>>, vector<8x1xf32>
    tpu.vector_store %arg8[%c0_19, %c0_20], %30 {strides = array<i32>} : memref<8x1xf32, #tpu.memory_space<vmem>>, vector<8x1xf32>,
    %c0_21 = arith.constant 0 : index
    %c0_22 = arith.constant 0 : index
    %32 = vector.load %arg9[%c0_21, %c0_22] : memref<8x1xf32, #tpu.memory_space<vmem>>, vector<8x1xf32>
    %33 = arith.mulf %10, %7 : vector<8x8xf32>
    %cst_23 = arith.constant dense<0.000000e+00> : vector<8xf32>
    %34 = vector.multi_reduction <add>, %33, %cst_23 [1] : vector<8x8xf32> to vector<8xf32>
    %35 = vector.shape_cast %34 : vector<8xf32> to vector<8x1xf32>
    %36 = arith.addf %32, %35 : vector<8x1xf32>
    %c0_24 = arith.constant 0 : index
    %c0_25 = arith.constant 0 : index
    %37 = vector.load %arg9[%c0_24, %c0_25] : memref<8x1xf32, #tpu.memory_space<vmem>>, vector<8x1xf32>
    tpu.vector_store %arg9[%c0_24, %c0_25], %36 {strides = array<i32>} : memref<8x1xf32, #tpu.memory_space<vmem>>, vector<8x1xf32>,
    %c0_26 = arith.constant 0 : index
    %c0_27 = arith.constant 0 : index
    %38 = vector.load %arg6[%c0_26, %c0_27] : memref<8x1xf32, #tpu.memory_space<vmem>>, vector<8x1xf32>
    tpu.vector_store %arg6[%c0_26, %c0_27], %14 {strides = array<i32>} : memref<8x1xf32, #tpu.memory_space<vmem>>, vector<8x1xf32>,
    %c0_i32_28 = arith.constant 0 : i32
    %39 = arith.cmpi eq, %arg1, %c0_i32_28 : i32
    %40 = arith.extui %39 : i1 to i32
    %c0_i32_29 = arith.constant 0 : i32
    %41 = arith.cmpi ne, %40, %c0_i32_29 : i32
    scf.if %41 {
      %c0_30 = arith.constant 0 : index
      %c0_31 = arith.constant 0 : index
      %42 = vector.load %arg6[%c0_30, %c0_31] : memref<8x1xf32, #tpu.memory_space<vmem>>, vector<8x1xf32>
      %c0_32 = arith.constant 0 : index
      %c0_33 = arith.constant 0 : index
      %43 = vector.load %arg7[%c0_32, %c0_33] : memref<8x1xf32, #tpu.memory_space<vmem>>, vector<8x1xf32>
      %44 = math.log %43 : vector<8x1xf32>
      %45 = arith.addf %42, %44 : vector<8x1xf32>
      %c0_34 = arith.constant 0 : index
      %c0_35 = arith.constant 0 : index
      %46 = vector.load %arg9[%c0_34, %c0_35] : memref<8x1xf32, #tpu.memory_space<vmem>>, vector<8x1xf32>
      %c0_36 = arith.constant 0 : index
      %c0_37 = arith.constant 0 : index
      %47 = vector.load %arg8[%c0_36, %c0_37] : memref<8x1xf32, #tpu.memory_space<vmem>>, vector<8x1xf32>
      %48 = arith.divf %46, %47 : vector<8x1xf32>
      %49 = arith.subf %48, %45 : vector<8x1xf32>
      %cst_38 = arith.constant -1.000000e+00 : f32
      %50 = vector.broadcast %cst_38 : f32 to vector<8x1xf32>
      %51 = arith.mulf %50, %49 : vector<8x1xf32>
      %c0_39 = arith.constant 0 : index
      %c0_40 = arith.constant 0 : index
      %52 = vector.load %arg5[%c0_39, %c0_40] : memref<8x1xf32, #tpu.memory_space<vmem>>, vector<8x1xf32>
      tpu.vector_store %arg5[%c0_39, %c0_40], %51 {strides = array<i32>} : memref<8x1xf32, #tpu.memory_space<vmem>>, vector<8x1xf32>,
    } else {
    }
    return
  }
  func.func @transform_0(%arg0: i32, %arg1: i32) -> (i32, i32) {
    %c0_i32 = arith.constant 0 : i32
    %c0_i32_0 = arith.constant 0 : i32
    return %arg0, %c0_i32 : i32, i32
  }
  func.func @transform_1(%arg0: i32, %arg1: i32) -> (i32, i32) {
    %c0_i32 = arith.constant 0 : i32
    %c0_i32_0 = arith.constant 0 : i32
    return %c0_i32, %arg1 : i32, i32
  }
  func.func @transform_2(%arg0: i32, %arg1: i32) -> (i32, i32) {
    %c0_i32 = arith.constant 0 : i32
    return %arg0, %arg1 : i32, i32
  }
  func.func @transform_3(%arg0: i32, %arg1: i32) -> (i32, i32) {
    %c0_i32 = arith.constant 0 : i32
    %c0_i32_0 = arith.constant 0 : i32
    return %arg0, %c0_i32 : i32, i32
  }
}

</mosaic_0001>

<bundles_post_ra>
// kernel: tpu_custom_call.1
= control target key start
LH: loop header
LB: loop body
LE: loop exit
PB: predicated region body
PF: predicated region fallthrough
CT: control target
= control target key end

     0   :  { %vm56_vm0 = vcmask 64512   ;;  %vm28_vm1 = vcmask 261120   ;;  %vm18_vm2 = vcmask 7168   ;;  %v140_v8 = vmov 0.0   ;;  %s197_s1 = inlined_call_operand.vmem [shape: f32[32,8], index: 1, kind: input, shape index: {}]   ;;  %s198_s2 = inlined_call_operand.vmem [shape: f32[8,8], index: 2, kind: input, shape index: {}]   ;;  %s199_s0 = inlined_call_operand.vmem [shape: f32[8,32], index: 0, kind: input, shape index: {}]   ;;  %s200_s3 = inlined_call_operand.vmem [shape: f32[8,1], index: 3, kind: output, shape index: {}]  }
   0x1   :  { %v27_v0 = vld [vmem:[%s197_s1 + $0x18] sm:$0xff]  ;;  %v26_v1 = vld [vmem:[%s197_s1 + $0x10] sm:$0xff]  ;;  %v53_v2 = vld [vmem:[%s198_s2] sm:$0xff]  ;;  %21 = vst.msk [vmem:[#allocation4] sm:$0xff] %vm18_vm2, %v140_v8  ;;  %v141_v9 = vmov -inf   ;;  %v142_v18 = vmov 0  }
   0x2   :  { %44 = vmatpush.msra.mxu0 %v27_v0  ;;  %v25_v3 = vld [vmem:[%s197_s1 + $0x8] sm:$0xff]  ;;  %v54_v4 = vsub.f32 1.0, %v53_v2  ;;  %v24_v5 = vld [vmem:[%s197_s1] sm:$0xff]  ;;  %20 = vst.msk [vmem:[#allocation3] sm:$0xff] %vm18_vm2, %v140_v8  ;;  %131 = vset.pattern.permute.xlu0 %v142_v18 }
   0x3   :  { %v23_v7 = vld [vmem:[%s199_s0] sm:$0xff]  ;;  %22 = vst.msk [vmem:[#allocation5] sm:$0xff] %vm18_vm2, %v140_v8 }
   0x4   :  { %45 = vmatpush.msra.mxu0 %v26_v1  ;;  %v82_v6 = vsel %vm56_vm0, %v54_v4, 0.0  ;;  %19 = vst.msk [vmem:[#allocation2] sm:$0xff] %vm18_vm2, %v141_v9 }
   0x5   :  { %83 = vadd.xlane.f32.xlu1 %v82_v6 }
   0x6   :  { %46 = vmatpush.msra.mxu0 %v25_v3 }
   0x8   :  { %47 = vmatpush.msra.mxu0 %v24_v5  ;;  %v81_v10 = vld [vmem:[#allocation4] sm:$0xff] }
   0x9   :  { %127 = vmatmul.msk.f32.vlgmr.msra.gmra.mxu0 %vm28_vm1, %v23_v7  ;;  %v64_v36 = vld [vmem:[#allocation3] sm:$0xff] }
   0xa   :  { %v87_v21 = vld [vmem:[#allocation5] sm:$0xff] }
   0xb   :  { %v55_v19 = vld [vmem:[#allocation2] sm:$0xff] }
  0x78   :  { %v84_v11 = vpop.xlane.xlu1 %83 }
  0x79   :  { %v85_v12 = vadd.f32 %v84_v11, %v81_v10 }
  0x7b   :  { %86 = vst.msk [vmem:[#allocation4] sm:$0xff] %vm18_vm2, %v85_v12 }
  0x82   :  { %v104_v32 = vld [vmem:[#allocation4] sm:$0xff] }
  0x83   :  { %vm110_vm3 = vweird.f32 %v104_v32  ;;  %v116_v43 = vand.u32 2147483648, %v104_v32  ;;  %v114_v45 = vand.u32 2147483647, %v104_v32 }
  0x85   :  { %v117_v47 = vor.u32 1.1754944e-38, %v116_v43  ;;  %vm115_vm6 = vcmp.eq.f32.partialorder %v114_v45, 8.507059e+37 }
  0x86   :  { %v49_v13 = vpop.f32.mrf.mxu0 }
  0x87   :  { %v52_v14 = vmul.f32 20.0, %v49_v13 }
  0x89   :  { %v57_v15 = vsel %vm56_vm0, %v52_v14, -inf  ;;  %v88_v16 = vmul.f32 %v54_v4, %v52_v14 }
  0x8a   :  { %58 = vmax.xlane.f32.xlu0 %v57_v15 }
  0x8b   :  { %v89_v17 = vsel %vm56_vm0, %v88_v16, 0.0 }
  0x8c   :  { %90 = vadd.xlane.f32.xlu2 %v89_v17 }
  0xfd   :  { %v59_v20 = vpop.xlane.xlu0 %58 }
  0xfe   :  { %v60_v22 = vmax.f32 %v55_v19, %v59_v20 }
  0xff   :  { %v91_v23 = vpop.xlane.xlu2 %90 }
 0x100   :  { %v61_v24 = vsub.f32 %v55_v19, %v60_v22  ;;  %94 = vst.msk [vmem:[#allocation2] sm:$0xff] %vm18_vm2, %v60_v22  ;;  %v92_v25 = vadd.f32 %v91_v23, %v87_v21  ;;  %68 = vperm.xlu0 %131, %v60_v22  }
 0x102   :  { %93 = vst.msk [vmem:[#allocation5] sm:$0xff] %vm18_vm2, %v92_v25  ;;  %v62_v33 = vmul.f32 1.442695, %v61_v24 }
 0x107   :  { %v98_v53 = vld [vmem:[#allocation2] sm:$0xff] }
 0x109   :  { %v103_v51 = vld [vmem:[#allocation5] sm:$0xff] }
 0x172   :  { %v69_v26 = vpop.permute.xlu0 %68 }
 0x173   :  { %v71_v27 = vsub.f32 %v52_v14, %v69_v26 }
 0x175   :  { %v72_v28 = vmul.f32 1.442695, %v71_v27 }
 0x177   :  { %132 = vpow2.f32 %v72_v28 }
 0x178   :  { %134 = vrcp.f32 %v104_v32 }
 0x179   :  { %136 = vpow2.f32 %v62_v33 }
 0x17d   :  { %v133_v29 = vpop.eup %132 }
 0x17e   :  { %v74_v30 = vmul.f32 %v133_v29, %v53_v2  ;;  %v135_v34 = vpop.eup %134 }
 0x17f   :  { %v137_v35 = vpop.eup %136  ;;  %v106_v37 = vmul.f32 %v135_v34, %v104_v32  ;;  %vm111_vm4 = vweird.f32 %v135_v34 }
 0x180   :  { %v75_v31 = vsel %vm56_vm0, %v74_v30, 0.0  ;;  %v65_v38 = vmul.f32 %v137_v35, %v64_v36  ;;  %vm112_vm5 = vmor %vm110_vm3, %vm111_vm4 }
 0x181   :  { %76 = vadd.xlane.f32.xlu1 %v75_v31  ;;  %v107_v41 = vsub.f32 1.0, %v106_v37 }
 0x183   :  { %v108_v42 = vmul.f32 %v135_v34, %v107_v41 }
 0x185   :  { %v109_v44 = vadd.f32 %v135_v34, %v108_v42 }
 0x187   :  { %v113_v48 = vsel %vm112_vm5, %v135_v34, %v109_v44 }
 0x188   :  { %v118_v50 = vsel %vm115_vm6, %v117_v47, %v113_v48 }
 0x189   :  { %v119_v54 = vmul.f32 %v118_v50, %v103_v51 }
 0x1f4   :  { %v77_v39 = vpop.xlane.xlu1 %76 }
 0x1f5   :  { %v78_v40 = vadd.f32 %v77_v39, %v65_v38 }
 0x1f7   :  { %80 = vst.msk [vmem:[#allocation3] sm:$0xff] %vm18_vm2, %v78_v40 }
 0x1fe   :  { %v99_v46 = vld [vmem:[#allocation3] sm:$0xff] }
 0x1ff   :  { %138 = vlog2.f32 %v99_v46 }
 0x205   :  { %v139_v49 = vpop.eup %138 }
 0x206   :  { %v101_v52 = vmul.f32 0.6931472, %v139_v49 }
 0x208   :  { %v102_v55 = vadd.f32 %v101_v52, %v98_v53 }
 0x20a   :  { %v120_v56 = vsub.f32 %v119_v54, %v102_v55 }
 0x20c   :  { %v121_v57 = vmul.f32 -1.0, %v120_v56 }
 0x20e   :  { %122 = vst.msk [vmem:[%s200_s3] sm:$0xff] %vm18_vm2, %v121_v57 }

</bundles_post_ra>
